<compile_context>
chip_gen: v7x
topology: tpu7x:2x2x1
jax: 0.10.0
libtpu: 0.0.40
codegen_flags: <defaults>
</compile_context>

<pallas_src>
import functools
import math

import jax
import jax.numpy as jnp
from jax import lax
from jax.experimental import pallas as pl
from jax.experimental.pallas import tpu as pltpu


def _lora_linear_kernel(*refs, rank, scaling_rank, has_bias):
    it = iter(refs)
    x_ref = next(it)                       # (tm, tk)
    w_ref = next(it)                       # (tn, tk)
    mla_ref = mlb_ref = None
    if scaling_rank:
        mla_ref = next(it)                 # (s, tk)  or (1, tk)
        mlb_ref = next(it)                 # (tn, s)  or (1, tn)
    p_ref = lb_ref = None
    if rank:
        p_ref = next(it)                   # (tm, r) fp32, hoisted x @ lora_a.T
        lb_ref = next(it)                  # (tn, r)
    b_ref = next(it) if has_bias else None  # (1, tn)
    o_ref = next(it)                       # (tm, tn)
    acc_ref = next(it)                     # (tm, tn) fp32 scratch

    k = pl.program_id(2)
    n_k = pl.num_programs(2)
    dn_t = (((1,), (1,)), ((), ()))        # contract last dims: A @ B.T, no transpose copy

    @pl.when(k == 0)
    def _init():
        acc_ref[...] = jnp.zeros_like(acc_ref)

    x = x_ref[...]

    # ---- main term: x @ (weight * scale).T, never materializing an (N, K) temp ----
    if scaling_rank == 1:
        # (mlb @ mla)_ij == mlb_i * mla_j: fold the K-factor onto x here,
        # the N-factor onto the accumulator once in the epilogue.
        xs = x * mla_ref[...].astype(x.dtype)                         # (1, tk) bcast
        acc_ref[...] += lax.dot_general(xs, w_ref[...], dn_t,
                                        preferred_element_type=jnp.float32)
    elif scaling_rank:
        # Build the (tn, tk) scale with VPU broadcast outer products (s is tiny);
        # no MXU matmul, no extra fp32 tile round-trips. 1/s folded into mlb.
        mlb = mlb_ref[...].astype(jnp.float32) * (1.0 / scaling_rank)  # (tn, s)
        mla = mla_ref[...].astype(jnp.float32)                         # (s, tk)
        scale = mlb[:, 0:1] * mla[0:1, :]
        for t in range(1, scaling_rank):
            scale = scale + mlb[:, t:t + 1] * mla[t:t + 1, :]
        w = w_ref[...] * scale.astype(w_ref.dtype)
        acc_ref[...] += lax.dot_general(x, w, dn_t,
                                        preferred_element_type=jnp.float32)
    else:
        acc_ref[...] += lax.dot_general(x, w_ref[...], dn_t,
                                        preferred_element_type=jnp.float32)

    # ---- epilogue: column scale, LoRA correction, bias, cast, store ----
    @pl.when(k == n_k - 1)
    def _epilogue():
        out = acc_ref[...]
        if scaling_rank == 1:
            out = out * mlb_ref[...].astype(jnp.float32)               # (1, tn) bcast
        if rank:
            lb = lb_ref[...].astype(jnp.float32) * (1.0 / rank)        # (tn, r), tiny
            out = out + lax.dot_general(p_ref[...], lb, dn_t,
                                        preferred_element_type=jnp.float32)
        if has_bias:
            out = out + b_ref[...].astype(jnp.float32)                 # (1, tn) bcast
        o_ref[...] = out.astype(o_ref.dtype)


def _round_up(v, m):
    return (v + m - 1) // m * m


def _choose_tile(dim, target, align):
    """Return (tile, padded_dim). Prefers an aligned divisor; else pads the dim."""
    if dim <= target:
        return dim, dim                       # single full-dim block (always legal)
    target = max((target // align) * align, align)
    t = target
    while t >= align:
        if dim % t == 0:
            return t, dim
        t -= align
    return target, _round_up(dim, target)     # pad-and-slice path


def _vmem_capacity_bytes():
    try:
        info = pltpu.get_tpu_info()
        return int(getattr(info, "vmem_capacity_bytes", 64 * 1024 * 1024))
    except Exception:
        return 64 * 1024 * 1024               # conservative (v7x per-TC)


def lora_linear(x, weight, bias, multi_lora_a, multi_lora_b, lora_a, lora_b,
                rank, scaling_rank, *, bm=512, bn=512, bk=512):
    """Pallas implementation of LoRALinear.forward (general branch)."""
    orig_dtype = x.dtype
    *lead, in_features = x.shape
    out_features = weight.shape[0]
    m = math.prod(lead) if lead else 1
    x2d = x.reshape(m, in_features)
    has_bias = bias is not None

    # dtype-aware sublane alignment for the row tile (8 fp32 / 16 bf16 / 32 int8).
    itemsize = jnp.dtype(orig_dtype).itemsize
    sub = 8 * max(1, 4 // itemsize)

    tm, pm = _choose_tile(m, bm, sub)
    tn, pn = _choose_tile(out_features, bn, 128)
    tk, pk = _choose_tile(in_features, bk, 128)

    # Zero-pad to tiled extents when needed (exact: padded rows/cols contribute 0).
    if pm != m or pk != in_features:
        x2d = jnp.pad(x2d, ((0, pm - m), (0, pk - in_features)))
    w = weight
    if pn != out_features or pk != in_features:
        w = jnp.pad(w, ((0, pn - out_features), (0, pk - in_features)))

    inputs = [x2d, w]
    in_specs = [
        pl.BlockSpec((tm, tk), lambda i, j, k: (i, k)),     # x
        pl.BlockSpec((tn, tk), lambda i, j, k: (j, k)),     # weight (N, K)
    ]

    if scaling_rank:
        mla = multi_lora_a
        if pk != in_features:
            mla = jnp.pad(mla, ((0, 0), (0, pk - in_features)))
        if scaling_rank == 1:
            mlb = multi_lora_b.reshape(1, out_features)     # lane-dense column factor
            if pn != out_features:
                mlb = jnp.pad(mlb, ((0, 0), (0, pn - out_features)))
            mlb_spec = pl.BlockSpec((1, tn), lambda i, j, k: (0, j))
        else:
            mlb = multi_lora_b                              # (N, s)
            if pn != out_features:
                mlb = jnp.pad(mlb, ((0, pn - out_features), (0, 0)))
            mlb_spec = pl.BlockSpec((tn, scaling_rank), lambda i, j, k: (j, 0))
        inputs += [mla, mlb]
        in_specs += [pl.BlockSpec((scaling_rank, tk), lambda i, j, k: (0, k)),
                     mlb_spec]

    if rank:
        la = lora_a
        if pk != in_features:
            la = jnp.pad(la, ((0, 0), (0, pk - in_features)))
        # Hoisted LoRA projection: tiny (M, r) fp32 matmul outside the hot loop.
        p = jnp.dot(x2d, la.T, preferred_element_type=jnp.float32)
        lb = lora_b
        if pn != out_features:
            lb = jnp.pad(lb, ((0, pn - out_features), (0, 0)))
        inputs += [p, lb]
        in_specs += [pl.BlockSpec((tm, rank), lambda i, j, k: (i, 0)),
                     pl.BlockSpec((tn, rank), lambda i, j, k: (j, 0))]

    if has_bias:
        b2d = bias.reshape(1, out_features)
        if pn != out_features:
            b2d = jnp.pad(b2d, ((0, 0), (0, pn - out_features)))
        inputs.append(b2d)
        in_specs.append(pl.BlockSpec((1, tn), lambda i, j, k: (0, j)))

    grid = (pm // tm, pn // tn, pk // tk)
    n_i, n_j, _ = grid

    # VMEM scoped limit: generous on v5e/v6e (128 MiB physical), capped on v7x (64 MiB).
    vmem_cap = _vmem_capacity_bytes()
    vmem_limit = max(32 * 1024 * 1024,
                     min(vmem_cap - 16 * 1024 * 1024, 100 * 1024 * 1024))

    # Advisory cost: x is re-read N/tn times, W re-read M/tm times; lora flops are hoisted.
    w_itemsize = jnp.dtype(w.dtype).itemsize
    bytes_accessed = int(x2d.size * itemsize * n_j
                         + w.size * w_itemsize * n_i
                         + pm * pn * itemsize)
    flops = int(2 * pm * pn * pk + (2 * pm * pn * rank if rank else 0))

    kernel = functools.partial(_lora_linear_kernel, rank=rank,
                               scaling_rank=scaling_rank, has_bias=has_bias)

    out2d = pl.pallas_call(
        kernel,
        out_shape=jax.ShapeDtypeStruct((pm, pn), orig_dtype),
        grid_spec=pltpu.PrefetchScalarGridSpec(
            num_scalar_prefetch=0,
            grid=grid,
            in_specs=in_specs,
            out_specs=pl.BlockSpec((tm, tn), lambda i, j, k: (i, j)),
            scratch_shapes=[pltpu.VMEM((tm, tn), jnp.float32)],   # fp32 accumulator
        ),
        compiler_params=pltpu.CompilerParams(
            dimension_semantics=("parallel", "parallel", "arbitrary"),
            vmem_limit_bytes=vmem_limit,
        ),
        cost_estimate=pl.CostEstimate(flops=flops, transcendentals=0,
                                      bytes_accessed=bytes_accessed),
    )(*inputs)

    if pm != m or pn != out_features:
        out2d = out2d[:m, :out_features]
    return out2d.reshape(*lead, out_features)


def lora_linear_ref(x, weight, bias, multi_lora_a, multi_lora_b, lora_a,
                    lora_b, rank, scaling_rank):
    """Pure-JAX reference mirroring the PyTorch forward (else-branch)."""
    hp = lax.Precision.HIGHEST
    w = weight
    if scaling_rank:
        w = w * jnp.matmul(multi_lora_b, multi_lora_a, precision=hp) / scaling_rank
    if rank:
        w = w + jnp.matmul(lora_b, lora_a, precision=hp) / rank
    out = jnp.matmul(x, w.T, precision=hp)
    if bias is not None:
        out = out + bias
    return out


def _run_case(key, batch, seq, in_features, out_features, rank, scaling_rank,
              use_bias, init_scale=-0.05, **tile_kwargs):
    ks = jax.random.split(key, 8)
    weight = jax.random.normal(ks[0], (out_features, in_features), jnp.float32) * 0.1
    bias = (jax.random.normal(ks[1], (out_features,), jnp.float32) * 0.1
            if use_bias else None)
    if rank:
        lora_a = jax.random.normal(ks[2], (rank, in_features), jnp.float32) * init_scale
        lora_b = jax.random.normal(ks[3], (out_features, rank), jnp.float32) * init_scale
    else:
        lora_a = lora_b = None
    if scaling_rank:
        multi_lora_a = (jnp.ones((scaling_rank, in_features), jnp.float32)
                        + jax.random.normal(ks[4], (scaling_rank, in_features),
                                            jnp.float32) * init_scale)
        multi_lora_b = (jnp.ones((out_features, scaling_rank), jnp.float32)
                        + jax.random.normal(ks[5], (out_features, scaling_rank),
                                            jnp.float32) * init_scale)
    else:
        multi_lora_a = multi_lora_b = None
    x = jax.random.normal(ks[6], (batch, seq, in_features), jnp.float32)

    out = lora_linear(x, weight, bias, multi_lora_a, multi_lora_b,
                      lora_a, lora_b, rank, scaling_rank, **tile_kwargs)
    out = jax.block_until_ready(out)
    ref = lora_linear_ref(x, weight, bias, multi_lora_a, multi_lora_b,
                          lora_a, lora_b, rank, scaling_rank)
    assert out.shape == (batch, seq, out_features)
    # TPU f32 matmuls run through bf16 MXU passes and the kernel factors the
    # computation differently from the fp32-HIGHEST reference.
    assert jnp.allclose(out, ref, atol=2e-2, rtol=2e-2), (
        float(jnp.max(jnp.abs(out - ref))))


if __name__ == "__main__":
    key = jax.random.PRNGKey(0)
    k1, k2, k3, k4 = jax.random.split(key, 4)

    # Factorized scaling_rank==1 path, rank>0, small tiles -> real (2, 2, 2) grid.
    _run_case(k1, batch=2, seq=16, in_features=256, out_features=256,
              rank=4, scaling_rank=1, use_bias=True, bm=16, bn=128, bk=128)

    # General scaling_rank>1 path (VPU outer-product scale), rank>0, (2, 2, 2) grid.
    _run_case(k2, batch=2, seq=16, in_features=256, out_features=256,
              rank=4, scaling_rank=2, use_bias=True, bm=16, bn=128, bk=128)

    # rank==0, no bias, default (large) tiles -> single-block grid.
    _run_case(k3, batch=2, seq=16, in_features=256, out_features=256,
              rank=0, scaling_rank=2, use_bias=False)

    # Non-divisible K / N exercising the zero-pad + output-slice path.
    _run_case(k4, batch=2, seq=12, in_features=160, out_features=192,
              rank=3, scaling_rank=2, use_bias=True, bm=16, bn=128, bk=128)

    print("KERNEL_OK")
</pallas_src>

<mosaic_0001>
module attributes {stable_mosaic.version = 11 : i64} {
  func.func @_lora_linear_kernel(%arg0: i32, %arg1: i32, %arg2: i32, %arg3: memref<16x128xf32, #tpu.memory_space<vmem>>, %arg4: memref<128x128xf32, #tpu.memory_space<vmem>>, %arg5: memref<1x128xf32, #tpu.memory_space<vmem>>, %arg6: memref<1x128xf32, #tpu.memory_space<vmem>>, %arg7: memref<16x4xf32, #tpu.memory_space<vmem>>, %arg8: memref<128x4xf32, #tpu.memory_space<vmem>>, %arg9: memref<1x128xf32, #tpu.memory_space<vmem>>, %arg10: memref<16x128xf32, #tpu.memory_space<vmem>>, %arg11: memref<16x128xf32, #tpu.memory_space<vmem>>) attributes {dimension_semantics = [#tpu.dimension_semantics<parallel>, #tpu.dimension_semantics<parallel>, #tpu.dimension_semantics<arbitrary>], iteration_bounds = array<i64: 2, 2, 2>, scalar_prefetch = 0 : i64, scratch_operands = 1 : i64, tpu.core_type = #tpu.core_type<tc>, window_params = [{transform_indices = @transform_0, window_bounds = array<i64: 16, 128>}, {transform_indices = @transform_1, window_bounds = array<i64: 128, 128>}, {transform_indices = @transform_2, window_bounds = array<i64: 1, 128>}, {transform_indices = @transform_3, window_bounds = array<i64: 1, 128>}, {transform_indices = @transform_4, window_bounds = array<i64: 16, 4>}, {transform_indices = @transform_5, window_bounds = array<i64: 128, 4>}, {transform_indices = @transform_6, window_bounds = array<i64: 1, 128>}, {transform_indices = @transform_7, window_bounds = array<i64: 16, 128>}]} {
    %c0_i32 = arith.constant 0 : i32
    %0 = arith.cmpi eq, %arg2, %c0_i32 : i32
    %1 = arith.extui %0 : i1 to i32
    %c0_i32_0 = arith.constant 0 : i32
    %2 = arith.cmpi ne, %1, %c0_i32_0 : i32
    scf.if %2 {
      %cst_11 = arith.constant 0.000000e+00 : f32
      %15 = vector.broadcast %cst_11 : f32 to vector<16x128xf32>
      %c0_12 = arith.constant 0 : index
      %c0_13 = arith.constant 0 : index
      %16 = vector.load %arg11[%c0_12, %c0_13] : memref<16x128xf32, #tpu.memory_space<vmem>>, vector<16x128xf32>
      tpu.vector_store %arg11[%c0_12, %c0_13], %15 {strides = array<i32>} : memref<16x128xf32, #tpu.memory_space<vmem>>, vector<16x128xf32>,
    } else {
    }
    %c0 = arith.constant 0 : index
    %c0_1 = arith.constant 0 : index
    %3 = vector.load %arg3[%c0, %c0_1] : memref<16x128xf32, #tpu.memory_space<vmem>>, vector<16x128xf32>
    %c0_2 = arith.constant 0 : index
    %c0_3 = arith.constant 0 : index
    %4 = vector.load %arg5[%c0_2, %c0_3] : memref<1x128xf32, #tpu.memory_space<vmem>>, vector<1x128xf32>
    %5 = vector.broadcast %4 : vector<1x128xf32> to vector<16x128xf32>
    %6 = arith.mulf %3, %5 : vector<16x128xf32>
    %c0_4 = arith.constant 0 : index
    %c0_5 = arith.constant 0 : index
    %7 = vector.load %arg11[%c0_4, %c0_5] : memref<16x128xf32, #tpu.memory_space<vmem>>, vector<16x128xf32>
    %c0_6 = arith.constant 0 : index
    %c0_7 = arith.constant 0 : index
    %8 = vector.load %arg4[%c0_6, %c0_7] : memref<128x128xf32, #tpu.memory_space<vmem>>, vector<128x128xf32>
    %cst = arith.constant dense<0.000000e+00> : vector<16x128xf32>
    %9 = tpu.matmul %6, %8, %cst {dimension_numbers = #tpu.dot_dimension_numbers<[1], [1], [0], [0], [0, 0, 1, 0], [], []>} : vector<16x128xf32>, vector<128x128xf32>, vector<16x128xf32> -> vector<16x128xf32>
    %10 = arith.addf %7, %9 : vector<16x128xf32>
    %c0_8 = arith.constant 0 : index
    %c0_9 = arith.constant 0 : index
    %11 = vector.load %arg11[%c0_8, %c0_9] : memref<16x128xf32, #tpu.memory_space<vmem>>, vector<16x128xf32>
    tpu.vector_store %arg11[%c0_8, %c0_9], %10 {strides = array<i32>} : memref<16x128xf32, #tpu.memory_space<vmem>>, vector<16x128xf32>,
    %c1_i32 = arith.constant 1 : i32
    %12 = arith.cmpi eq, %arg2, %c1_i32 : i32
    %13 = arith.extui %12 : i1 to i32
    %c0_i32_10 = arith.constant 0 : i32
    %14 = arith.cmpi ne, %13, %c0_i32_10 : i32
    scf.if %14 {
      %c0_11 = arith.constant 0 : index
      %c0_12 = arith.constant 0 : index
      %15 = vector.load %arg11[%c0_11, %c0_12] : memref<16x128xf32, #tpu.memory_space<vmem>>, vector<16x128xf32>
      %c0_13 = arith.constant 0 : index
      %c0_14 = arith.constant 0 : index
      %16 = vector.load %arg6[%c0_13, %c0_14] : memref<1x128xf32, #tpu.memory_space<vmem>>, vector<1x128xf32>
      %17 = vector.broadcast %16 : vector<1x128xf32> to vector<16x128xf32>
      %18 = arith.mulf %15, %17 : vector<16x128xf32>
      %c0_15 = arith.constant 0 : index
      %c0_16 = arith.constant 0 : index
      %19 = vector.load %arg8[%c0_15, %c0_16] : memref<128x4xf32, #tpu.memory_space<vmem>>, vector<128x4xf32>
      %cst_17 = arith.constant 2.500000e-01 : f32
      %20 = vector.broadcast %cst_17 : f32 to vector<128x4xf32>
      %21 = arith.mulf %19, %20 : vector<128x4xf32>
      %c0_18 = arith.constant 0 : index
      %c0_19 = arith.constant 0 : index
      %22 = vector.load %arg7[%c0_18, %c0_19] : memref<16x4xf32, #tpu.memory_space<vmem>>, vector<16x4xf32>
      %cst_20 = arith.constant dense<0.000000e+00> : vector<16x128xf32>
      %23 = tpu.matmul %22, %21, %cst_20 {dimension_numbers = #tpu.dot_dimension_numbers<[1], [1], [0], [0], [0, 0, 1, 0], [], []>} : vector<16x4xf32>, vector<128x4xf32>, vector<16x128xf32> -> vector<16x128xf32>
      %24 = arith.addf %18, %23 : vector<16x128xf32>
      %c0_21 = arith.constant 0 : index
      %c0_22 = arith.constant 0 : index
      %25 = vector.load %arg9[%c0_21, %c0_22] : memref<1x128xf32, #tpu.memory_space<vmem>>, vector<1x128xf32>
      %26 = vector.broadcast %25 : vector<1x128xf32> to vector<16x128xf32>
      %27 = arith.addf %24, %26 : vector<16x128xf32>
      %c0_23 = arith.constant 0 : index
      %c0_24 = arith.constant 0 : index
      %28 = vector.load %arg10[%c0_23, %c0_24] : memref<16x128xf32, #tpu.memory_space<vmem>>, vector<16x128xf32>
      tpu.vector_store %arg10[%c0_23, %c0_24], %27 {strides = array<i32>} : memref<16x128xf32, #tpu.memory_space<vmem>>, vector<16x128xf32>,
    } else {
    }
    return
  }
  func.func @transform_0(%arg0: i32, %arg1: i32, %arg2: i32) -> (i32, i32) {
    %c0_i32 = arith.constant 0 : i32
    return %arg0, %arg2 : i32, i32
  }
  func.func @transform_1(%arg0: i32, %arg1: i32, %arg2: i32) -> (i32, i32) {
    %c0_i32 = arith.constant 0 : i32
    return %arg1, %arg2 : i32, i32
  }
  func.func @transform_2(%arg0: i32, %arg1: i32, %arg2: i32) -> (i32, i32) {
    %c0_i32 = arith.constant 0 : i32
    %c0_i32_0 = arith.constant 0 : i32
    return %c0_i32, %arg2 : i32, i32
  }
  func.func @transform_3(%arg0: i32, %arg1: i32, %arg2: i32) -> (i32, i32) {
    %c0_i32 = arith.constant 0 : i32
    %c0_i32_0 = arith.constant 0 : i32
    return %c0_i32, %arg1 : i32, i32
  }
  func.func @transform_4(%arg0: i32, %arg1: i32, %arg2: i32) -> (i32, i32) {
    %c0_i32 = arith.constant 0 : i32
    %c0_i32_0 = arith.constant 0 : i32
    return %arg0, %c0_i32 : i32, i32
  }
  func.func @transform_5(%arg0: i32, %arg1: i32, %arg2: i32) -> (i32, i32) {
    %c0_i32 = arith.constant 0 : i32
    %c0_i32_0 = arith.constant 0 : i32
    return %arg1, %c0_i32 : i32, i32
  }
  func.func @transform_6(%arg0: i32, %arg1: i32, %arg2: i32) -> (i32, i32) {
    %c0_i32 = arith.constant 0 : i32
    %c0_i32_0 = arith.constant 0 : i32
    return %c0_i32, %arg1 : i32, i32
  }
  func.func @transform_7(%arg0: i32, %arg1: i32, %arg2: i32) -> (i32, i32) {
    %c0_i32 = arith.constant 0 : i32
    return %arg0, %arg1 : i32, i32
  }
}

</mosaic_0001>

<bundles_post_ra>
// kernel: tpu_custom_call.1
= control target key start
LH: loop header
LB: loop body
LE: loop exit
PB: predicated region body
PF: predicated region fallthrough
CT: control target
= control target key end

     0   :  { %s1992_s0 = inlined_call_operand.vmem [shape: f32[32,256], index: 0, kind: input, shape index: {}]   ;;  %s1993_s1 = inlined_call_operand.hbm [shape: f32[256,256], index: 1, kind: input, shape index: {}]   ;;  %s1994_s2 = inlined_call_operand.vmem [shape: f32[1,256], index: 2, kind: input, shape index: {}]   ;;  %s1995_s3 = inlined_call_operand.vmem [shape: f32[1,256], index: 3, kind: input, shape index: {}]   ;;  %s1996_s4 = inlined_call_operand.vmem [shape: f32[32,4], index: 4, kind: input, shape index: {}]   ;;  %s1997_s5 = inlined_call_operand.vmem [shape: f32[256,4], index: 5, kind: input, shape index: {}]   ;;  %s1998_s6 = inlined_call_operand.vmem [shape: f32[1,256], index: 6, kind: input, shape index: {}]   ;;  %s1999_s7 = inlined_call_operand.hbm [shape: f32[32,256], index: 7, kind: output, shape index: {}]  }
   0x1   :  { %2014 = sst [smem:[#allocation25_spill]] %s1992_s0 }
   0x2   :  { %2015 = sst [smem:[#allocation26_spill]] %s1993_s1 }
   0x3   :  { %2016 = sst [smem:[#allocation27_spill]] %s1994_s2 }
   0x4   :  { %2017 = sst [smem:[#allocation28_spill]] %s1995_s3 }
   0x5   :  { %2018 = sst [smem:[#allocation29_spill]] %s1996_s4 }
   0x6   :  { %2019 = sst [smem:[#allocation30_spill]] %s1997_s5 }
   0x7   :  { %2020 = sst [smem:[#allocation31_spill]] %s1998_s6 }
   0x8   :  { %2021 = sst [smem:[#allocation32_spill]] %s1999_s7 }
   0x9   :  { %12 = vsyncpa [#allocation5], 0 }
   0xa   :  { %14 = vsyncpa [#allocation5 + $0x1], 0 }
   0xb   :  { %15 = vsyncpa [#allocation6], 0 }
   0xc   :  { %17 = vsyncpa [#allocation6 + $0x1], 0  ;;  %s1568_s24 = smov 0   ;;  %s1570_s25 = smov 0  }
   0xd   :  { %s1572_s26 = smov 0   ;;  %s1574_s27 = smov 0  }
   0xe   :  { %s1576_s28 = smov 0   ;;  %s1578_s29 = smov 0  }
   0xf   :  { %s1580_s30 = smov 0   ;;  %s1582_s8 = smov 0  }
  0x10   :  { %s1584_s9 = smov 0   ;;  %s1586_s10 = smov 0  }
  0x11   :  { %s1588_s11 = smov 0   ;;  %s1590_s12 = smov 0  }
  0x12   :  { %s1592_s13 = smov 0   ;;  %s1594_s14 = smov 0  }
  0x13   :  { %s1596_s15 = smov 0  }
  0x14 LB: > { %2022 = sst [smem:[#allocation10_spill]] %s1469_s26  ;;  %s35_s18 = sadd.s32 1, %s1505_s12  ;;  %s1517_s15 = sphi %s1596_s15, %s23_s15   ;;  %s1513_s14 = sphi %s1594_s14, %s2081_s14   ;;  %s1509_s13 = sphi %s1592_s13, %s2080_s13   ;;  %s1505_s12 = sphi %s1590_s12, %s2079_s12   ;;  %s1501_s11 = sphi %s1588_s11, %s2078_s11   ;;  %s1497_s10 = sphi %s1586_s10, %s2077_s10   ;;  %s1493_s9 = sphi %s1584_s9, %s2076_s9   ;;  %s1489_s8 = sphi %s1582_s8, %s2075_s8   ;;  %s1485_s30 = sphi %s1580_s30, %s2074_s30   ;;  %s1481_s29 = sphi %s1578_s29, %s2073_s29   ;;  %s1477_s28 = sphi %s1576_s28, %s2072_s28   ;;  %s1473_s27 = sphi %s1574_s27, %s2071_s27   ;;  %s1469_s26 = sphi %s1572_s26, %s2070_s26   ;;  %s1465_s25 = sphi %s1570_s25, %s2083_s25   ;;  %s1461_s24 = sphi %s1568_s24, %s2082_s24  }
  0x15   : > { %2023 = sst [smem:[#allocation11_spill]] %s1477_s28  ;;  %s38_s19 = sadd.s32 1, %s1509_s13 }
  0x16   : > { %2024 = sst [smem:[#allocation12_spill]] %s1481_s29  ;;  %p36_p0 = scmp.ge.s32.totalorder %s35_s18, 2 }
  0x17   : > { %2025 = sst [smem:[#allocation13_spill]] %s1489_s8  ;;  %s42_s20 = sadd.s32 1, %s1513_s14 }
  0x18   : > { %2026 = sst [smem:[#allocation14_spill]] %s1497_s10  ;;  %s51_s21 = sadd.s32 1, %s1489_s8 }
  0x19   : > { %2027 = sst [smem:[#allocation15_spill]] %s1501_s11  ;;  %p58_p1 = scmp.ne.s32.totalorder %s1489_s8, %s1485_s30 }
  0x1a   : > { %2028 = sst [smem:[#allocation16_spill]] %s1505_s12  ;;  %s2085_s18 = smov (%p36_p0, %s35_s18), 0 }
  0x1b   : > { %2029 = sst [smem:[#allocation17_spill]] %s1509_s13  ;;  %s2087_s19 = smov (!%p36_p0, %s38_s19), %s1509_s13 }
  0x1c   : > { %2030 = sst [smem:[#allocation18_spill]] %s1513_s14  ;;  %s47_s22 = ssub.s32 %s1505_s12, %s2085_s18 }
  0x1d   : > { %2031 = sst [smem:[#allocation19_spill]] %s2085_s18  ;;  %p59_p2 = scmp.eq.s32.totalorder %s1517_s15, 0 }
  0x1e   : > { %p40_p3 = scmp.ge.s32.totalorder %s2087_s19, 2  ;;  %s79_s23 = sadd.s32 1, %s1481_s29 }
  0x1f   : > { %p1658_p4 = por %p59_p2, %p58_p1  ;;  %p86_p5 = scmp.ne.s32.totalorder %s1481_s29, %s1477_s28 }
  0x20   : > { %s2089_s19 = smov (%p40_p3, %s2087_s19), 0  ;;  %s2091_s20 = smov (!%p40_p3, %s42_s20), %s1513_s14 }
  0x21   : > { %2033 = sst [smem:[#allocation20_spill]] %s2089_s19  ;;  %s74_s16 = ssub.s32 %s1509_s13, %s2089_s19 }
  0x22   : > { %p1669_p6 = por %p86_p5, %p59_p2  ;;  %p44_p7 = scmp.ge.s32.totalorder %s2091_s20, 2 }
  0x23   : > { %s76_s18 = sor.u32 %s74_s16, %s47_s22  ;;  %p92_p9 = scmp.ne.s32.totalorder %s1477_s28, %s1473_s27 }
  0x24   : > { %p77_p8 = scmp.eq.s32.totalorder %s76_s18, 0  ;;  %s2093_s20 = smov (%p44_p7, %s2091_s20), 0 }
  0x25   : > { %2035 = sst [smem:[#allocation21_spill]] %s2093_s20  ;;  %s46_s5 = ssub.s32 %s1513_s14, %s2093_s20 }
  0x26   : > { %s1678_s19 = scalar_select %p77_p8, %s1481_s29, %s79_s23  }
  0x27   : > { %s2037_s4 = sadd.s32 4294967295, %s1517_s15   ;;  %s48_s6 = sor.u32 %s47_s22, %s46_s5 }
  0x28   : > { %2036 = sst [smem:[#allocation22_spill]] %s1678_s19  ;;  %p93_p10 = scmp.eq.s32.totalorder %s2037_s4, 0 }
  0x29   : > { %s234_s3 = sor.u32 %s74_s16, %s46_s5  ;;  %p49_p11 = scmp.eq.s32.totalorder %s48_s6, 0 }
  0x2a   : > { %p1684_p12 = por %p93_p10, %p92_p9  ;;  %p235_p13 = scmp.eq.s32.totalorder %s234_s3, 0 }
  0x2b   : > { %s237_s18 = sadd.s32 1, %s1469_s26  ;;  %p247_p0 = scmp.ne.s32.totalorder %s1469_s26, %s1465_s25 }
  0x2c   : > { %s1690_s11 = scalar_select %p49_p11, %s1489_s8, %s51_s21  }
  0x2d   : > { %s1693_s27 = scalar_select %p235_p13, %s1469_s26, %s237_s18  }
  0x2e   : > { %2039 = sst [smem:[#allocation23_spill]] %s1690_s11  ;;  %s2041_s10 = smov %s2037_s4 }
  0x2f   : > { %2040 = sst [smem:[#allocation24_spill]] %s1693_s27  ;;  %p248_p1 = scmp.eq.s32.totalorder %s2041_s10, 7 }
  0x30   : > { %p253_p2 = scmp.ne.s32.totalorder %s1465_s25, %s1461_s24  ;;  %s2042_s23 = sadd.s32 4294967294, %s1517_s15  }
  0x31   : > { %p254_p3 = scmp.eq.s32.totalorder %s2042_s23, 7  ;;  %p1703_p5 = por %p248_p1, %p247_p0 }
  0x32   : > { %p964_p8 = scmp.ge.s32.totalorder %s1517_s15, 8 }
  0x33   : > { %s2043_s4 = scalar_select %p1703_p5, 1, 0 }
  0x34   : > { %p1707_p7 = por %p254_p3, %p253_p2  ;;  %270 = sbr.rel (%p964_p8) target bundleno = 103 (0x67), region = 16 }
  0x36   : > { %s2044_s5 = scalar_select %p1707_p7, 1, 0 }
  0x3b   : > { %273 = sbr.rel (!%p1658_p4) target bundleno = 70 (0x46), region = 20  ;;  %s275_s3 = sand.u32 (%p1658_p4), 1, %s1489_s8  }
  0x3c   : > { %s1010_s6 = sshll.u32 (%p1658_p4), %s1513_s14, 2  ;;  %s965_s10 = sshll.u32 (%p1658_p4), %s275_s3, 4 }
  0x3d   : > { %s280_s16 = sadd.s32 (%p1658_p4), %s1505_s12, %s1010_s6  ;;  %s2045_s0 = sld [smem:[#allocation25_spill]] (%p1658_p4) }
  0x3e   : > { %s968_s21 = sshll.u32 (%p1658_p4), %s280_s16, 3  ;;  %s277_s20 = scalar_lea.vmem (%p1658_p4), [#allocation3], %s965_s10 }
  0x43   : > { %s282_s23 = scalar_lea.vmem %s2045_s0, %s968_s21 }
  0x44   : > { %v312_v0 = vld [vmem:[%s282_s23] sm:$0xff]  ;;  %v314_v1 = vld [vmem:[%s282_s23 + $0x10] sm:$0xff] }
  0x45   : > { %313 = vst [vmem:[%s277_s20] sm:$0xff] %v312_v0  ;;  %315 = vst [vmem:[%s277_s20 + $0x8] sm:$0xff] %v314_v1 }
  0x46 PF: > { %s322_s17 = sand.u32 1, %s1481_s29   ;;  %s1011_s11 = sshll.u32 %s1509_s13, 5 }
  0x47   : > { %s969_s14 = sshll.u32 %s322_s17, 7  ;;  %s332_s3 = sadd.s32 %s1505_s12, %s1011_s11 }
  0x48   : > { %s972_s6 = sshll.u32 %s332_s3, 7  ;;  %s326_s16 = scalar_lea.vmem [#allocation4], %s969_s14 }
  0x49   : > { %s335_s8 = sshll.u32 %s326_s16, 4  ;;  %s2046_s1 = sld [smem:[#allocation26_spill]]  ;;  %s1728_s8 = int_to_ptr.vmem [resolvable:$true] %s335_s8 }
  0x4a   : > { %s1730_s20 = scalar_lea.sflag [#allocation5], %s322_s17 }
  0x4f   : > { %s1726_s21 = scalar_lea.hbm %s2046_s1, %s972_s6  ;;  %s1339_s18 = scalar_lea.hbm %s2046_s1, 8192 }
  0x50   : > { %s1335_s10 = scalar_lea.hbm %s1726_s21, 2048  ;;  %p1340_p11 = scmp.lt.u32.totalorder %s1726_s21, %s2046_s1 }
  0x51   : > { %p1336_p4 = scmp.ne.s32.totalorder %s1726_s21, %s1335_s10  ;;  %p1341_p13 = scmp.lt.u32.totalorder %s1339_s18, %s1335_s10 }
  0x52   : > { %p1343_p1 = scmp.lt.u32.totalorder %s1335_s10, %s1726_s21 }
  0x53   : > { %p1337_p9 = pnand %p1336_p4, %p1669_p6  ;;  %p1342_p0 = por %p1341_p13, %p1340_p11 }
  0x55   : > { %p1338_p10 = pneg %p1337_p9  ;;  %p1344_p2 = por %p1343_p1, %p1342_p0 }
  0x57   : > { %p1345_p3 = pnand %p1344_p2, %p1338_p10 }
  0x59   : > { %1348 = shalt.err (!%p1345_p3)
}
  0x5a   : > { %s1349_s17 = scalar_lea.vmem %s1728_s8, 2048  ;;  %s1519_s3 = smov [#allocation4]  }
  0x5b   : > { %p1350_p8 = scmp.ne.s32.totalorder %s1728_s8, %s1349_s17  ;;  %s1353_s6 = sshll.u32 %s1519_s3, 4  ;;  %s1354_s6 = int_to_ptr.vmem [resolvable:$false] %s1353_s6 }
  0x5c   : > { %s1355_s16 = scalar_lea.vmem %s1354_s6, 4096  ;;  %p1356_p7 = scmp.lt.s32.totalorder %s1728_s8, %s1354_s6 }
  0x5d   : > { %p1351_p4 = pnand %p1350_p8, %p1669_p6  ;;  %p1357_p5 = scmp.lt.s32.totalorder %s1355_s16, %s1349_s17 }
  0x5f   : > { %p1352_p9 = pneg %p1351_p4  ;;  %p1358_p11 = por %p1357_p5, %p1356_p7 }
  0x61   : > { %p1359_p13 = pnand %p1358_p11, %p1352_p9 }
  0x63   : > { %1362 = shalt.err (!%p1359_p13)
}
  0x64   : > { %s1520_s22 = smov 256   ;;  %s1521_s10 = smov 128  }
  0x65   : > { %s1522_s11 = smov 8  }
  0x66   : > { %1199 = dma.hbm_to_vmem [thread:$0]  (%p1669_p6), %s1726_s21, 2048, %s1728_s8, %s1730_s20, %s1520_s22, %s1521_s10, %s1522_s11  }
  0x67 PF: > { %p973_p10 = scmp.ge.s32.totalorder %s1517_s15, 1  ;;  %p379_p0 = scmp.lt.s32.totalorder %s1517_s15, 9 }
  0x69   : > { %p380_p1 = pnand %p973_p10, %p379_p0 }
  0x6a   : > { %s386_s14 = sand.u32 (!%p380_p1), 1, %s1485_s30   ;;  %s392_s18 = sand.u32 (!%p380_p1), 1, %s1477_s28  }
  0x6b   : > { %383 = sbr.rel (%p380_p1) target bundleno = 664 (0x298), region = 82  ;;  %s1758_s19 = sshll.u32 (!%p380_p1), %s386_s14, 4 }
  0x6c   : > { %s975_s23 = sshll.u32 (!%p380_p1), %s392_s18, 7  ;;  %s393_s3 = scalar_lea.sflag (!%p380_p1), [#allocation5], %s392_s18 }
  0x6d   : > { %s1761_s7 = scalar_lea.vmem (!%p380_p1), [#allocation4], %s975_s23 }
  0x72   : > { %1452 = dma.done.wait (%p1684_p12), %s393_s3, 2048  }
  0x73   : > { %1454 = vsyncadd (%p1684_p12), %s393_s3, 4294965248  ;;  %s2047_s8 = sld [smem:[#allocation14_spill]]  ;;  %s2048_s21 = sld [smem:[#allocation15_spill]] }
  0x74   : > { %s2008_s30 = sand.u32 1, %s1465_s25   ;;  %p452_p6 = scmp.lt.s32.totalorder %s1493_s9, 1 }
  0x75   : > { %s976_s20 = sshll.u32 %s2008_s30, 4  ;;  %s2050_s3 = sld [smem:[#allocation28_spill]] }
  0x76   : > { %s1774_s16 = scalar_select %p452_p6, %s1493_s9, 1 }
  0x77   : > { %s2051_s1 = sld [smem:[#allocation31_spill]]  ;;  %s2052_s27 = sld [smem:[#allocation29_spill]] }
  0x78   : > { %s2053_s26 = sld [smem:[#allocation30_spill]]  ;;  %p981_p2 = scmp.ne.s32.totalorder %s1493_s9, 0 }
  0x79   : > { %p455_p5 = scmp.lt.s32.totalorder %s2047_s8, 1  ;;  %s977_s6 = sshll.u32 %s2048_s21, 1  ;;  %v1523_v2 = vmov (!%p981_p2), 0.0  }
  0x7a   : > { %p459_p12 = scmp.lt.s32.totalorder %s977_s6, 3  ;;  %s979_s0 = sshll.u32 %s2047_s8, 4  ;;  %478 = vst [vmem:[#allocation2] sm:$0xff] (!%p981_p2), %v1523_v2  ;;  %479 = vst [vmem:[#allocation2 + $0x8] sm:$0xff] (!%p981_p2), %v1523_v2 }
  0x7b   : > { %s1777_s22 = scalar_select %p455_p5, %s2047_s8, 1 }
  0x7c   : > { %s2095_s6 = smov (!%p459_p12, %s977_s6), 3  ;;  %p465_p7 = scmp.lt.s32.totalorder %s979_s0, 31 }
  0x7d   : > { %s457_s17 = scalar_lea.vmem %s2050_s3, %s1777_s22  ;;  %s472_s13 = scalar_lea.vmem %s2051_s1, %s1777_s22 }
  0x7e   : > { %s978_s12 = sshll.u32 %s2095_s6, 3  ;;  %s2097_s0 = smov (!%p465_p7, %s979_s0), 31 }
  0x7f   : > { %s1795_s2 = scalar_lea.vmem %s2052_s27, %s978_s12  ;;  %s980_s10 = sshll.u32 %s2097_s0, 3 }
  0x80   : > { %s1800_s18 = scalar_lea.vmem %s2053_s26, %s980_s10  ;;  %s1802_s8 = scalar_lea.vmem [#allocation7], %s976_s20 }
  0x81   : > { %477 = sbr.rel (%p981_p2) target bundleno = 136 (0x88), region = 94 }
  0x88 PF: > { %v493_v3 = vld [vmem:[%s1761_s7] sm:$0xff]  ;;  %v494_v4 = vld [vmem:[%s1761_s7 + $0x8] sm:$0xff]  ;;  %v495_v5 = vld [vmem:[%s1761_s7 + $0x10] sm:$0xff]  ;;  %s2054_s0 = scalar_lea.vmem [#allocation3], %s1758_s19  ;;  %s2055_s28 = sld [smem:[#allocation27_spill]] }
  0x89   : > { %v1119_v6 = vpack.c.bf16 %v494_v4, %v493_v3  ;;  %v496_v7 = vld [vmem:[%s1761_s7 + $0x18] sm:$0xff]  ;;  %v480_v9 = vld [vmem:[%s2054_s0] sm:$0xff]  ;;  %v498_v11 = vld [vmem:[%s1761_s7 + $0x28] sm:$0xff]  ;;  %s2057_s12 = smov %s2054_s0  ;;  %p983_p3 = scmp.ne.s32.totalorder %s1493_s9, 1 }
  0x8a   : > { %v1123_v8 = vpack.c.bf16 %v496_v7, %v495_v5  ;;  %v497_v10 = vld [vmem:[%s1761_s7 + $0x20] sm:$0xff]  ;;  %v499_v15 = vld [vmem:[%s1761_s7 + $0x30] sm:$0xff]  ;;  %v500_v16 = vld [vmem:[%s1761_s7 + $0x38] sm:$0xff]  ;;  %vm637_vm0 = vcmask (!%p983_p3), 31744  }
  0x8b   : > { %1120 = vmatprep.subr.bf16.mxu0 %v1119_v6  ;;  %v1127_v14 = vpack.c.bf16 %v498_v11, %v497_v10  ;;  %v1131_v17 = vpack.c.bf16 %v500_v16, %v499_v15  ;;  %v501_v18 = vld [vmem:[%s1761_s7 + $0x40] sm:$0xff]  ;;  %v502_v19 = vld [vmem:[%s1761_s7 + $0x48] sm:$0xff]  ;;  %v503_v21 = vld [vmem:[%s1761_s7 + $0x50] sm:$0xff] }
  0x8c   : > { %1122 = vmatpush3.bf16.xpose.msra.mxu0 %v1119_v6  ;;  %v1135_v20 = vpack.c.bf16 %v502_v19, %v501_v18  ;;  %v504_v22 = vld [vmem:[%s1761_s7 + $0x58] sm:$0xff]  ;;  %v505_v24 = vld [vmem:[%s1761_s7 + $0x60] sm:$0xff]  ;;  %v506_v25 = vld [vmem:[%s1761_s7 + $0x68] sm:$0xff] }
  0x8d   : > { %1124 = vmatprep.subr.bf16.mxu0 %v1123_v8  ;;  %v1139_v23 = vpack.c.bf16 %v504_v22, %v503_v21  ;;  %v1143_v26 = vpack.c.bf16 %v506_v25, %v505_v24  ;;  %v507_v27 = vld [vmem:[%s1761_s7 + $0x70] sm:$0xff]  ;;  %v508_v28 = vld [vmem:[%s1761_s7 + $0x78] sm:$0xff]  ;;  %v605_v40 = vld [vmem:[%s1800_s18 + $0x10] sm:$0xff] (!%p983_p3) }
  0x8e   : > { %s2056_s29 = scalar_lea.vmem %s2055_s28, %s1774_s16  ;;  %v1147_v29 = vpack.c.bf16 %v508_v28, %v507_v27  ;;  %v481_v30 = vld [vmem:[%s2057_s12 + $0x8] sm:$0xff]  ;;  %v491_v33 = vld [vmem:[#allocation2] sm:$0xff]  ;;  %v606_v43 = vld [vmem:[%s1800_s18 + $0x18] sm:$0xff] (!%p983_p3)  ;;  %v621_v44 = vmul.f32 (!%p983_p3), 0.25, %v605_v40 }
  0x8f   : > { %v982_v12 = vld [vmem:[%s2056_s29] ss:$0 sm:$0xff]  ;;  %v492_v32 = vld [vmem:[#allocation2 + $0x8] sm:$0xff]  ;;  %vm1837_vm1 = vmpackc.low (!%p983_p3), %vm637_vm0, %vm637_vm0  ;;  %v622_v46 = vmul.f32 (!%p983_p3), 0.25, %v606_v43 }
  0x90   : > { %v489_v13 = vmul.f32 %v982_v12, %v480_v9  ;;  %v490_v31 = vmul.f32 %v982_v12, %v481_v30  ;;  %v603_v38 = vld [vmem:[%s1800_s18] sm:$0xff] (!%p983_p3)  ;;  %v604_v39 = vld [vmem:[%s1800_s18 + $0x8] sm:$0xff] (!%p983_p3)  ;;  %v609_v55 = vld [vmem:[%s1800_s18 + $0x30] sm:$0xff] (!%p983_p3) }
  0x91   : > { %v619_v41 = vmul.f32 (!%p983_p3), 0.25, %v603_v38  ;;  %v620_v42 = vmul.f32 (!%p983_p3), 0.25, %v604_v39  ;;  %v1157_v48 = vpack.c.bf16 (!%p983_p3), %v622_v46, %v621_v44  ;;  %v607_v49 = vld [vmem:[%s1800_s18 + $0x20] sm:$0xff] (!%p983_p3)  ;;  %v608_v50 = vld [vmem:[%s1800_s18 + $0x28] sm:$0xff] (!%p983_p3)  ;;  %v610_v56 = vld [vmem:[%s1800_s18 + $0x38] sm:$0xff] (!%p983_p3)  ;;  %v625_v57 = vmul.f32 (!%p983_p3), 0.25, %v609_v55 }
  0x92   : > { %1081 = vmatprep.mubr.f32.mxu0 %v489_v13  ;;  %v635_v51 = vld [vmem:[%s1795_s2] sm:$0xff] (!%p983_p3)  ;;  %v623_v52 = vmul.f32 (!%p983_p3), 0.25, %v607_v49  ;;  %v624_v53 = vmul.f32 (!%p983_p3), 0.25, %v608_v50  ;;  %v626_v58 = vmul.f32 (!%p983_p3), 0.25, %v610_v56  ;;  %v612_v61 = vld [vmem:[%s1800_s18 + $0x48] sm:$0xff] (!%p983_p3)  ;;  %v613_v1 = vld [vmem:[%s1800_s18 + $0x50] sm:$0xff] (!%p983_p3) }
  0x93   : > { %v1151_v47 = vpack.c.bf16 (!%p983_p3), %v620_v42, %v619_v41  ;;  %v611_v60 = vld [vmem:[%s1800_s18 + $0x40] sm:$0xff] (!%p983_p3)  ;;  %v628_v63 = vmul.f32 (!%p983_p3), 0.25, %v612_v61  ;;  %v614_v2 = vld [vmem:[%s1800_s18 + $0x58] sm:$0xff] (!%p983_p3)  ;;  %v629_v3 = vmul.f32 (!%p983_p3), 0.25, %v613_v1  ;;  %v616_v7 = vld [vmem:[%s1800_s18 + $0x68] sm:$0xff] (!%p983_p3) }
  0x94   : > { %1126 = vmatpush3.bf16.xpose.msra.mxu0 %v1123_v8  ;;  %v1163_v54 = vpack.c.bf16 (!%p983_p3), %v624_v53, %v623_v52  ;;  %v1169_v59 = vpack.c.bf16 (!%p983_p3), %v626_v58, %v625_v57  ;;  %v627_v62 = vmul.f32 (!%p983_p3), 0.25, %v611_v60  ;;  %v630_v4 = vmul.f32 (!%p983_p3), 0.25, %v614_v2  ;;  %v615_v6 = vld [vmem:[%s1800_s18 + $0x60] sm:$0xff] (!%p983_p3)  ;;  %v617_v11 = vld [vmem:[%s1800_s18 + $0x70] sm:$0xff] (!%p983_p3)  ;;  %v618_v12 = vld [vmem:[%s1800_s18 + $0x78] sm:$0xff] (!%p983_p3) }
  0x95   : > { %1128 = vmatprep.subr.bf16.mxu0 %v1127_v14  ;;  %v631_v8 = vmul.f32 (!%p983_p3), 0.25, %v615_v6  ;;  %v632_v9 = vmul.f32 (!%p983_p3), 0.25, %v616_v7  ;;  %v633_v13 = vmul.f32 (!%p983_p3), 0.25, %v617_v11  ;;  %v636_v16 = vld [vmem:[%s1795_s2 + $0x8] sm:$0xff] (!%p983_p3)  ;;  %v984_v18 = vld [vmem:[%s457_s17] ss:$0 sm:$0xff] (!%p983_p3) }
  0x96   : > { %v1175_v0 = vpack.c.bf16 (!%p983_p3), %v628_v63, %v627_v62  ;;  %v1181_v5 = vpack.c.bf16 (!%p983_p3), %v630_v4, %v629_v3 }
  0x97   : > { %v1187_v10 = vpack.c.bf16 (!%p983_p3), %v632_v9, %v631_v8 }
  0x9c   : > { %1130 = vmatpush3.bf16.xpose.msra.mxu0 %v1127_v14  ;;  %v634_v14 = vmul.f32 (!%p983_p3), 0.25, %v618_v12 }
  0x9d   : > { %1132 = vmatprep.subr.bf16.mxu0 %v1131_v17 }
  0x9e   : > { %v1193_v15 = vpack.c.bf16 (!%p983_p3), %v634_v14, %v633_v13 }
  0xa4   : > { %1134 = vmatpush3.bf16.xpose.msra.mxu0 %v1131_v17 }
  0xa5   : > { %1136 = vmatprep.subr.bf16.mxu0 %v1135_v20 }
  0xac   : > { %1138 = vmatpush3.bf16.xpose.msra.mxu0 %v1135_v20 }
  0xad   : > { %1140 = vmatprep.subr.bf16.mxu0 %v1139_v23 }
  0xb4   : > { %1142 = vmatpush3.bf16.xpose.msra.mxu0 %v1139_v23  ;;  %v1003_v23 = vld [vmem:[%s472_s13] ss:$0 sm:$0xff] (!%p983_p3) }
  0xb5   : > { %1144 = vmatprep.subr.bf16.mxu0 %v1143_v26 }
  0xbc   : > { %1146 = vmatpush3.bf16.xpose.msra.mxu0 %v1143_v26 }
  0xbd   : > { %1148 = vmatprep.subr.bf16.mxu0 %v1147_v29 }
  0xc4   : > { %1150 = vmatpush3.bf16.xpose.msra.mxu0 %v1147_v29 }
  0xc5   : > { %1153 = vmatprep.subr.msk.bf16.mxu0 (!%p983_p3), %vm1837_vm1, %v1151_v47 }
  0xcb   : > { %1082 = vmatmul.mubr.f32.vlgmr.msra.gmra.mrb[0].mxu0 %v490_v31 }
  0xcc   : > { %1156 = vmatpush3.bf16.xpose.msk.msra.mxu0 (!%p983_p3), %vm1837_vm1, %v1151_v47  ;;  %1116 = vmatprep.mubr.msk.f32.mxu0 (!%p983_p3), %vm637_vm0, %v635_v51 }
  0xcd   : > { %1159 = vmatprep.subr.msk.bf16.mxu0 (!%p983_p3), %vm1837_vm1, %v1157_v48 }
  0xd4   : > { %1162 = vmatpush3.bf16.xpose.msk.msra.mxu0 (!%p983_p3), %vm1837_vm1, %v1157_v48 }
  0xd5   : > { %1165 = vmatprep.subr.msk.bf16.mxu0 (!%p983_p3), %vm1837_vm1, %v1163_v54 }
  0xdc   : > { %1168 = vmatpush3.bf16.xpose.msk.msra.mxu0 (!%p983_p3), %vm1837_vm1, %v1163_v54 }
  0xdd   : > { %1171 = vmatprep.subr.msk.bf16.mxu0 (!%p983_p3), %vm1837_vm1, %v1169_v59 }
  0xe4   : > { %1174 = vmatpush3.bf16.xpose.msk.msra.mxu0 (!%p983_p3), %vm1837_vm1, %v1169_v59 }
  0xe5   : > { %1177 = vmatprep.subr.msk.bf16.mxu0 (!%p983_p3), %vm1837_vm1, %v1175_v0 }
  0xec   : > { %1180 = vmatpush3.bf16.xpose.msk.msra.mxu0 (!%p983_p3), %vm1837_vm1, %v1175_v0 }
  0xed   : > { %1183 = vmatprep.subr.msk.bf16.mxu0 (!%p983_p3), %vm1837_vm1, %v1181_v5 }
  0xf4   : > { %1186 = vmatpush3.bf16.xpose.msk.msra.mxu0 (!%p983_p3), %vm1837_vm1, %v1181_v5 }
  0xf5   : > { %1189 = vmatprep.subr.msk.bf16.mxu0 (!%p983_p3), %vm1837_vm1, %v1187_v10 }
  0xfc   : > { %1192 = vmatpush3.bf16.xpose.msk.msra.mxu0 (!%p983_p3), %vm1837_vm1, %v1187_v10 }
  0xfd   : > { %1195 = vmatprep.subr.msk.bf16.mxu0 (!%p983_p3), %vm1837_vm1, %v1193_v15 }
 0x104   : > { %1198 = vmatpush3.bf16.xpose.msk.msra.mxu0 (!%p983_p3), %vm1837_vm1, %v1193_v15 }
 0x19c   : > { %591 = sbr.rel (%p983_p3) target bundleno = 633 (0x279), region = 98 }
 0x19e   : > { %v1083_v34 = vpop.f32.mrb[0].mxu0 }
 0x19f   : > { %v585_v35 = vadd.f32 %v1083_v34, %v492_v32  ;;  %v575_v36 = vpop.f32.mrb[1].mxu0  ;;  %1117 = vmatmul.mubr.msk.f32.vlgmr.msra.gmra.mrb[0].mxu0 (!%p983_p3), %vm637_vm0, %v636_v16 }
 0x1a0   : > { %v584_v37 = vadd.f32 %v575_v36, %v491_v33 }
 0x1a1   : > { %587 = vst [vmem:[#allocation2 + $0x8] sm:$0xff] %v585_v35 }
 0x1a2   : > { %586 = vst [vmem:[#allocation2] sm:$0xff] %v584_v37 }
 0x1a8   : > { %v593_v17 = vld [vmem:[#allocation2 + $0x8] sm:$0xff] }
 0x1a9   : > { %v592_v19 = vld [vmem:[#allocation2] sm:$0xff]  ;;  %v602_v20 = vmul.f32 %v984_v18, %v593_v17 }
 0x1aa   : > { %v601_v21 = vmul.f32 %v984_v18, %v592_v19 }
 0x272   : > { %v1118_v22 = vpop.f32.mrb[0].mxu0 }
 0x273   : > { %v768_v24 = vadd.f32 %v1118_v22, %v602_v20  ;;  %v758_v25 = vpop.f32.mrb[1].mxu0 }
 0x274   : > { %v767_v26 = vadd.f32 %v758_v25, %v601_v21 }
 0x275   : > { %v777_v27 = vadd.f32 %v1003_v23, %v768_v24 }
 0x276   : > { %v776_v28 = vadd.f32 %v1003_v23, %v767_v26 }
 0x277   : > { %779 = vst [vmem:[%s1802_s8 + $0x8] sm:$0xff] %v777_v27 }
 0x278   : > { %778 = vst [vmem:[%s1802_s8] sm:$0xff] %v776_v28 }
 0x279 PF: > { %s2062_s6 = sld [smem:[#allocation15_spill]]  ;;  %s2063_s16 = sld [smem:[#allocation14_spill]] }
 0x27a   : > { %s796_s23 = sshll.u32 %s1802_s8, 4  ;;  %s2064_s21 = sld [smem:[#allocation32_spill]]  ;;  %s1904_s23 = int_to_ptr.vmem [resolvable:$true] %s796_s23 }
 0x27b   : > { %s2065_s10 = sand.u32 1, %s1465_s25   ;;  %s1363_s18 = scalar_lea.vmem %s1904_s23, 256 }
 0x27c   : > { %s1913_s11 = scalar_lea.sflag [#allocation6], %s2065_s10  ;;  %p1364_p8 = scmp.ne.s32.totalorder %s1904_s23, %s1363_s18 }
 0x27d   : > { %p2066_p4 = scmp.ne.s32.totalorder %s2043_s4, 0  ;;  %s1524_s8 = smov [#allocation7]  }
 0x27e   : > { %s1367_s0 = sshll.u32 %s1524_s8, 4  ;;  %s1368_s0 = int_to_ptr.vmem [resolvable:$false] %s1367_s0 }
 0x27f   : > { %s1012_s17 = sshll.u32 %s2062_s6, 2  ;;  %p1365_p9 = pnand %p1364_p8, %p2066_p4 }
 0x280   : > { %s793_s14 = sadd.s32 %s2063_s16, %s1012_s17  ;;  %s1369_s1 = scalar_lea.vmem %s1368_s0, 512 }
 0x281   : > { %s1007_s3 = sshll.u32 %s793_s14, 7  ;;  %p1366_p11 = pneg %p1365_p9 }
 0x282   : > { %s1909_s2 = scalar_lea.hbm %s2064_s21, %s1007_s3  ;;  %p1370_p13 = scmp.lt.s32.totalorder %s1904_s23, %s1368_s0 }
 0x283   : > { %p1371_p10 = scmp.lt.s32.totalorder %s1369_s1, %s1363_s18 }
 0x285   : > { %p1372_p0 = por %p1371_p10, %p1370_p13 }
 0x287   : > { %p1373_p1 = pnand %p1372_p0, %p1366_p11 }
 0x289   : > { %1376 = shalt.err (!%p1373_p1)
}
 0x28a   : > { %s1377_s26 = scalar_lea.hbm %s1909_s2, 256  ;;  %s1381_s12 = scalar_lea.hbm %s2064_s21, 1024 }
 0x28b   : > { %p1378_p6 = scmp.ne.s32.totalorder %s1909_s2, %s1377_s26  ;;  %p1382_p7 = scmp.lt.u32.totalorder %s1909_s2, %s2064_s21 }
 0x28c   : > { %p1383_p2 = scmp.lt.u32.totalorder %s1381_s12, %s1377_s26  ;;  %p1385_p8 = scmp.lt.u32.totalorder %s1377_s26, %s1909_s2 }
 0x28d   : > { %p1379_p5 = pnand %p1378_p6, %p2066_p4 }
 0x28e   : > { %p1384_p3 = por %p1383_p2, %p1382_p7 }
 0x28f   : > { %p1380_p12 = pneg %p1379_p5 }
 0x290   : > { %p1386_p9 = por %p1385_p8, %p1384_p3 }
 0x292   : > { %p1387_p11 = pnand %p1386_p9, %p1380_p12 }
 0x294   : > { %1390 = shalt.err (!%p1387_p11)
}
 0x295   : > { %s1525_s19 = smov 128   ;;  %s1526_s7 = smov 256  }
 0x296   : > { %s1527_s30 = smov 8  }
 0x297   : > { %1201 = dma.vmem_to_hbm [thread:$0]  (%p2066_p4), %s1904_s23, 256, %s1909_s2, %s1913_s11, %s1525_s19, %s1526_s7, %s1527_s30  }
 0x298 PF: > { %p1207_p13 = scmp.ge.s32.totalorder %s1517_s15, 2  ;;  %s811_s20 = sand.u32 1, %s1461_s24  }
 0x299   : > { %p2067_p10 = scmp.ne.s32.totalorder %s2044_s5, 0  ;;  %s812_s6 = scalar_lea.sflag [#allocation6], %s811_s20 }
 0x29b   : > { %p1204_p0 = pnand %p1207_p13, %p2067_p10 }
 0x29d   : > { %1456 = dma.done.wait (!%p1204_p0), %s812_s6, 256  }
 0x29e   : > { %1458 = vsyncadd (!%p1204_p0), %s812_s6, 4294967040  ;;  %s23_s15 = sadd.s32 1, %s1517_s15   ;;  %s2069_s4 = sld [smem:[#allocation10_spill]] }
 0x29f   : > { %p1942_p1 = scmp.ge.s32.totalorder %s23_s15, 10   ;;  %s2070_s26 = sld [smem:[#allocation24_spill]] }
 0x2a0   : > { %s2071_s27 = sld [smem:[#allocation11_spill]]  ;;  %s2072_s28 = sld [smem:[#allocation12_spill]] }
 0x2a1   : > { %s2073_s29 = sld [smem:[#allocation22_spill]]  ;;  %s2074_s30 = sld [smem:[#allocation13_spill]] }
 0x2a2   : > { %s2075_s8 = sld [smem:[#allocation23_spill]]  ;;  %s2076_s9 = sld [smem:[#allocation16_spill]] }
 0x2a3   : > { %s2077_s10 = sld [smem:[#allocation17_spill]]  ;;  %s2078_s11 = sld [smem:[#allocation18_spill]] }
 0x2a4   : > { %s2079_s12 = sld [smem:[#allocation19_spill]]  ;;  %s2080_s13 = sld [smem:[#allocation20_spill]] }
 0x2a5   : > { %s2081_s14 = sld [smem:[#allocation21_spill]]  ;;  %s2082_s24 = smov %s1465_s25 }
 0x2a6   : > { %s2083_s25 = smov %s2069_s4  ;;  %22 = sbr.rel (!%p1942_p1) target bundleno = 20 (0x14), region = 162 }
 0x2ad   :  { %817 = vsyncpa [#allocation5], 1 }
 0x2ae   :  { %819 = vsyncpa [#allocation5 + $0x1], 1 }
 0x2af   :  { %820 = vsyncpa [#allocation6], 1 }
 0x2b0   :  { %822 = vsyncpa [#allocation6 + $0x1], 1 }

</bundles_post_ra>
